<compile_context>
chip_gen: v7x
topology: tpu7x:2x2x1
jax: 0.10.0
libtpu: 0.0.40
codegen_flags: <defaults>
</compile_context>

<pallas_src>
import jax
import jax.numpy as jnp
from jax.experimental import pallas as pl
from jax.experimental.pallas import tpu as pltpu

_BN_EPS = 1e-5
_LANE = 128


# ---------------------------------------------------------------------------
# Kernels   (grid = (N_tiles, K_tiles); K is the reduction axis, "arbitrary")
# ---------------------------------------------------------------------------
def _linear_bn_relu_kernel(x_ref, w_ref, b_ref, g_ref, be_ref, o_ref, acc_ref):
    """Linear (+bias) -> BatchNorm1d(training batch stats) -> ReLU."""
    k = pl.program_id(1)

    @pl.when(k == 0)
    def _():
        # Seed the accumulator with the broadcast bias: saves one (B, tn) VPU
        # add in the epilogue; the bias block is fetched anyway.
        acc_ref[...] = jnp.broadcast_to(b_ref[...], acc_ref.shape)

    acc_ref[...] += jnp.dot(x_ref[...], w_ref[...],
                            preferred_element_type=jnp.float32)

    @pl.when(k == pl.num_programs(1) - 1)
    def _():
        h = acc_ref[...]
        mu = jnp.mean(h, axis=0, keepdims=True)
        c = h - mu                                    # centered once, reused
        var = jnp.mean(c * c, axis=0, keepdims=True)
        scale = jax.lax.rsqrt(var + _BN_EPS) * g_ref[...]   # (1, tn) row vector
        o_ref[...] = jnp.maximum(c * scale + be_ref[...], 0.0).astype(o_ref.dtype)


def _linear_kernel(x_ref, w_ref, b_ref, o_ref, acc_ref):
    """Plain Linear with f32 accumulation."""
    k = pl.program_id(1)

    @pl.when(k == 0)
    def _():
        acc_ref[...] = jnp.broadcast_to(b_ref[...], acc_ref.shape)

    acc_ref[...] += jnp.dot(x_ref[...], w_ref[...],
                            preferred_element_type=jnp.float32)

    @pl.when(k == pl.num_programs(1) - 1)
    def _():
        o_ref[...] = acc_ref[...].astype(o_ref.dtype)


# ---------------------------------------------------------------------------
# Tiled layer wrapper
# ---------------------------------------------------------------------------
def _tiled_layer(kernel, x, w, vecs, out_dtype, tn, tk, vmem_limit):
    """x:(B,K) bf16, w:(K,N) bf16, vecs: (1,N) f32 row params. Returns (B,N).

    When tk == K the activation block index is constant across the grid, so the
    full activation block stays resident in VMEM and is read from HBM once.
    """
    B, K = x.shape
    _, N = w.shape
    grid = (N // tn, K // tk)

    in_specs = [
        pl.BlockSpec((B, tk), lambda n, k: (0, k)),      # activations
        pl.BlockSpec((tk, tn), lambda n, k: (k, n)),     # weight tile
        # TODO(synk): pipeline_mode=pl.Buffered(3) on the weight spec if the
        # weight DMA ever shows up exposed behind the MXU loop.
    ] + [pl.BlockSpec((1, tn), lambda n, k: (0, n)) for _ in vecs]

    return pl.pallas_call(
        kernel,
        out_shape=jax.ShapeDtypeStruct((B, N), out_dtype),
        grid=grid,
        in_specs=in_specs,
        out_specs=pl.BlockSpec((B, tn), lambda n, k: (0, n)),
        scratch_shapes=[pltpu.VMEM((B, tn), jnp.float32)],
        compiler_params=pltpu.CompilerParams(
            dimension_semantics=("parallel", "arbitrary"),
            vmem_limit_bytes=int(vmem_limit)),
    )(x, w, *vecs)


# ---------------------------------------------------------------------------
# Padding / tiling / VMEM helpers
# ---------------------------------------------------------------------------
def _round_up(n, m):
    return ((n + m - 1) // m) * m


def _pad_axis(a, axis, target, value=0.0):
    pad = target - a.shape[axis]
    if pad == 0:
        return a
    widths = [(0, 0)] * a.ndim
    widths[axis] = (0, pad)
    return jnp.pad(a, widths, constant_values=value)


def _pad_and_tiles(dim, tn_want, tk_want):
    """Pad `dim` to a multiple of its output-feature tile; pick a contraction
    tile that divides the padded size (never collapses below the n-tile)."""
    base = _round_up(dim, _LANE)
    tn = min(_round_up(tn_want, _LANE), base)
    padded = _round_up(dim, tn)
    tk = min(_round_up(tk_want, _LANE), padded)
    while padded % tk:
        tk -= _LANE
    return padded, tn, tk


def _vmem_limit_bytes():
    """Generation-aware scoped-VMEM budget: ~75% of physical VMEM, <= 100 MiB
    (~96 MiB on v5e/v6e with 128 MiB VMEM, ~48 MiB on v7x with 64 MiB)."""
    cap = None
    try:
        cap = getattr(pltpu.get_tpu_info(), "vmem_capacity_bytes", None)
    except Exception:
        cap = None
    if not cap:
        cap = 64 * 1024 * 1024            # conservative default (v7x physical)
    return int(min(cap * 3 // 4, 100 * 1024 * 1024))


def _fits_resident(B, K, tn, out_itemsize, vmem_limit):
    """Rough per-call VMEM estimate when tk == K (resident activations)."""
    x_bytes = 2 * B * K * 2               # bf16 activation block (double-buffered)
    w_bytes = 2 * K * tn * 2              # bf16 weight block (double-buffered)
    o_bytes = 2 * B * tn * out_itemsize   # output block (double-buffered)
    acc_bytes = B * tn * 4                # f32 accumulator scratch
    tmp_bytes = 2 * B * tn * 4            # f32 epilogue temporaries
    return x_bytes + w_bytes + o_bytes + acc_bytes + tmp_bytes <= vmem_limit


# ---------------------------------------------------------------------------
# One-time parameter preparation (padding + bf16 cast hoisted out of forward)
# ---------------------------------------------------------------------------
def prepare_params(params, *, tn=512, tk=1024):
    """params: pre-transposed (in,out) weights w1/w2/w3, (1,out) biases
    b1/b2/b3, BN affine g1/be1, g2/be2 (float32)."""
    in_dim, hid = params["w1"].shape
    out_dim = params["w3"].shape[1]

    in_p, _, tk_in = _pad_and_tiles(in_dim, tn, tk)
    hid_p, tn_hid, tk_hid = _pad_and_tiles(hid, tn, tk)
    out_p, tn_out, _ = _pad_and_tiles(out_dim, tn, tk)

    bf16, f32 = jnp.bfloat16, jnp.float32
    return dict(
        dims=(in_dim, hid, out_dim),
        padded=(in_p, hid_p, out_p),
        tiles=dict(l1=(tn_hid, tk_in), l2=(tn_hid, tk_hid), l3=(tn_out, tk_hid)),
        w1=_pad_axis(_pad_axis(params["w1"].astype(bf16), 0, in_p), 1, hid_p),
        w2=_pad_axis(_pad_axis(params["w2"].astype(bf16), 0, hid_p), 1, hid_p),
        w3=_pad_axis(_pad_axis(params["w3"].astype(bf16), 0, hid_p), 1, out_p),
        b1=_pad_axis(params["b1"].astype(f32), 1, hid_p),
        b2=_pad_axis(params["b2"].astype(f32), 1, hid_p),
        b3=_pad_axis(params["b3"].astype(f32), 1, out_p),
        g1=_pad_axis(params["g1"].astype(f32), 1, hid_p, value=1.0),
        g2=_pad_axis(params["g2"].astype(f32), 1, hid_p, value=1.0),
        be1=_pad_axis(params["be1"].astype(f32), 1, hid_p),
        be2=_pad_axis(params["be2"].astype(f32), 1, hid_p),
    )


# ---------------------------------------------------------------------------
# Public forward
# ---------------------------------------------------------------------------
def simclr_projection_head(x, prepped, *, force_streamed=False):
    """x: (B, input_dim) float32. prepped: output of prepare_params()."""
    _, _, out_dim = prepped["dims"]
    in_p, hid_p, _ = prepped["padded"]
    tn1, tk1 = prepped["tiles"]["l1"]
    tn2, tk2 = prepped["tiles"]["l2"]
    tn3, tk3 = prepped["tiles"]["l3"]
    B = x.shape[0]
    vmem = _vmem_limit_bytes()

    def eff_tk(K, tn, tk, out_itemsize):
        # Resident activations (tk == K, single HBM read) whenever they fit.
        if not force_streamed and _fits_resident(B, K, tn, out_itemsize, vmem):
            return K
        return tk

    # Only the input is padded / cast per call; weights were prepped once.
    xp = _pad_axis(x.astype(jnp.bfloat16), 1, in_p)

    # Layer 1: Linear -> BN -> ReLU (intermediate kept bf16 for the next MXU pass)
    h1 = _tiled_layer(_linear_bn_relu_kernel, xp, prepped["w1"],
                      (prepped["b1"], prepped["g1"], prepped["be1"]),
                      jnp.bfloat16, tn1, eff_tk(in_p, tn1, tk1, 2), vmem)
    # Layer 2: Linear -> BN -> ReLU
    h2 = _tiled_layer(_linear_bn_relu_kernel, h1, prepped["w2"],
                      (prepped["b2"], prepped["g2"], prepped["be2"]),
                      jnp.bfloat16, tn2, eff_tk(hid_p, tn2, tk2, 2), vmem)
    # Layer 3: Linear
    out = _tiled_layer(_linear_kernel, h2, prepped["w3"],
                       (prepped["b3"],), jnp.float32,
                       tn3, eff_tk(hid_p, tn3, tk3, 4), vmem)
    return out[:, :out_dim]


# ---------------------------------------------------------------------------
# Parameter init (matches nn.Linear default init; BN gamma=1, beta=0)
# ---------------------------------------------------------------------------
def init_params(key, input_dim, hidden_dim, output_dim):
    ks = jax.random.split(key, 6)

    def lin(kw, kb, fan_in, fan_out):
        bound = 1.0 / (fan_in ** 0.5)
        w = jax.random.uniform(kw, (fan_in, fan_out), jnp.float32, -bound, bound)
        b = jax.random.uniform(kb, (1, fan_out), jnp.float32, -bound, bound)
        return w, b

    w1, b1 = lin(ks[0], ks[1], input_dim, hidden_dim)
    w2, b2 = lin(ks[2], ks[3], hidden_dim, hidden_dim)
    w3, b3 = lin(ks[4], ks[5], hidden_dim, output_dim)
    ones = jnp.ones((1, hidden_dim), jnp.float32)
    zeros = jnp.zeros((1, hidden_dim), jnp.float32)
    return dict(w1=w1, b1=b1, g1=ones, be1=zeros,
                w2=w2, b2=b2, g2=ones, be2=zeros,
                w3=w3, b3=b3)


# ---------------------------------------------------------------------------
# Reference (same numerics: bf16 matmul inputs, f32 accumulation, f32 BN)
# ---------------------------------------------------------------------------
def reference(x, p):
    bf16 = jnp.bfloat16

    def bn_relu(h, g, be):
        mu = h.mean(0, keepdims=True)
        var = ((h - mu) ** 2).mean(0, keepdims=True)
        return jnp.maximum((h - mu) * jax.lax.rsqrt(var + _BN_EPS) * g + be, 0.0)

    h = jnp.dot(x.astype(bf16), p["w1"].astype(bf16),
                preferred_element_type=jnp.float32) + p["b1"]
    h = bn_relu(h, p["g1"], p["be1"]).astype(bf16)
    h = jnp.dot(h, p["w2"].astype(bf16),
                preferred_element_type=jnp.float32) + p["b2"]
    h = bn_relu(h, p["g2"], p["be2"]).astype(bf16)
    return jnp.dot(h, p["w3"].astype(bf16),
                   preferred_element_type=jnp.float32) + p["b3"]


if __name__ == "__main__":
    root = jax.random.PRNGKey(0)

    def run_case(case_id, batch, input_dim, hidden_dim, output_dim,
                 tn, tk, force_streamed):
        kx, kp = jax.random.split(jax.random.fold_in(root, case_id))
        x = jax.random.normal(kx, (batch, input_dim), jnp.float32)
        params = init_params(kp, input_dim, hidden_dim, output_dim)
        prepped = prepare_params(params, tn=tn, tk=tk)
        out = jax.block_until_ready(
            simclr_projection_head(x, prepped, force_streamed=force_streamed))
        ref = reference(x, params)
        assert out.shape == (batch, output_dim)
        err = float(jnp.max(jnp.abs(out - ref)))
        assert jnp.allclose(out, ref, atol=2e-2, rtol=2e-2), (case_id, err)

    # 1) Small module-consistent shapes (single tile per dim, resident x).
    run_case(0, 8, 32, 64, 16, 512, 1024, False)
    # 2) Multi-tile grid with resident activations (tk == K, several n-tiles).
    run_case(1, 16, 256, 384, 128, 128, 128, False)
    # 3) Same shapes through the K-streamed fallback (multi-step accumulator).
    run_case(2, 16, 256, 384, 128, 128, 128, True)

    print("KERNEL_OK")
</pallas_src>

<mosaic_0001>
module attributes {stable_mosaic.version = 11 : i64} {
  func.func @_linear_bn_relu_kernel(%arg0: i32, %arg1: i32, %arg2: memref<8x128xbf16, #tpu.memory_space<vmem>>, %arg3: memref<128x128xbf16, #tpu.memory_space<vmem>>, %arg4: memref<1x128xf32, #tpu.memory_space<vmem>>, %arg5: memref<1x128xf32, #tpu.memory_space<vmem>>, %arg6: memref<1x128xf32, #tpu.memory_space<vmem>>, %arg7: memref<8x128xbf16, #tpu.memory_space<vmem>>, %arg8: memref<8x128xf32, #tpu.memory_space<vmem>>) attributes {dimension_semantics = [#tpu.dimension_semantics<parallel>, #tpu.dimension_semantics<arbitrary>], iteration_bounds = array<i64: 1, 1>, scalar_prefetch = 0 : i64, scratch_operands = 1 : i64, tpu.core_type = #tpu.core_type<tc>, window_params = [{transform_indices = @transform_0, window_bounds = array<i64: 8, 128>}, {transform_indices = @transform_1, window_bounds = array<i64: 128, 128>}, {transform_indices = @transform_2, window_bounds = array<i64: 1, 128>}, {transform_indices = @transform_3, window_bounds = array<i64: 1, 128>}, {transform_indices = @transform_4, window_bounds = array<i64: 1, 128>}, {transform_indices = @transform_5, window_bounds = array<i64: 8, 128>}]} {
    %c0_i32 = arith.constant 0 : i32
    %0 = arith.cmpi eq, %arg1, %c0_i32 : i32
    %1 = arith.extui %0 : i1 to i32
    %c0_i32_0 = arith.constant 0 : i32
    %2 = arith.cmpi ne, %1, %c0_i32_0 : i32
    scf.if %2 {
      %c0_10 = arith.constant 0 : index
      %c0_11 = arith.constant 0 : index
      %12 = vector.load %arg4[%c0_10, %c0_11] : memref<1x128xf32, #tpu.memory_space<vmem>>, vector<1x128xf32>
      %13 = vector.shape_cast %12 : vector<1x128xf32> to vector<1x128xf32>
      %14 = vector.broadcast %13 : vector<1x128xf32> to vector<8x128xf32>
      %c0_12 = arith.constant 0 : index
      %c0_13 = arith.constant 0 : index
      %15 = vector.load %arg8[%c0_12, %c0_13] : memref<8x128xf32, #tpu.memory_space<vmem>>, vector<8x128xf32>
      tpu.vector_store %arg8[%c0_12, %c0_13], %14 {strides = array<i32>} : memref<8x128xf32, #tpu.memory_space<vmem>>, vector<8x128xf32>,
    } else {
    }
    %c0 = arith.constant 0 : index
    %c0_1 = arith.constant 0 : index
    %3 = vector.load %arg8[%c0, %c0_1] : memref<8x128xf32, #tpu.memory_space<vmem>>, vector<8x128xf32>
    %c0_2 = arith.constant 0 : index
    %c0_3 = arith.constant 0 : index
    %4 = vector.load %arg2[%c0_2, %c0_3] : memref<8x128xbf16, #tpu.memory_space<vmem>>, vector<8x128xbf16>
    %c0_4 = arith.constant 0 : index
    %c0_5 = arith.constant 0 : index
    %5 = vector.load %arg3[%c0_4, %c0_5] : memref<128x128xbf16, #tpu.memory_space<vmem>>, vector<128x128xbf16>
    %cst = arith.constant dense<0.000000e+00> : vector<8x128xf32>
    %6 = tpu.matmul %4, %5, %cst {dimension_numbers = #tpu.dot_dimension_numbers<[1], [0], [0], [1], [0, 0, 1, 1], [], []>} : vector<8x128xbf16>, vector<128x128xbf16>, vector<8x128xf32> -> vector<8x128xf32>
    %7 = arith.addf %3, %6 : vector<8x128xf32>
    %c0_6 = arith.constant 0 : index
    %c0_7 = arith.constant 0 : index
    %8 = vector.load %arg8[%c0_6, %c0_7] : memref<8x128xf32, #tpu.memory_space<vmem>>, vector<8x128xf32>
    tpu.vector_store %arg8[%c0_6, %c0_7], %7 {strides = array<i32>} : memref<8x128xf32, #tpu.memory_space<vmem>>, vector<8x128xf32>,
    %c0_i32_8 = arith.constant 0 : i32
    %9 = arith.cmpi eq, %arg1, %c0_i32_8 : i32
    %10 = arith.extui %9 : i1 to i32
    %c0_i32_9 = arith.constant 0 : i32
    %11 = arith.cmpi ne, %10, %c0_i32_9 : i32
    scf.if %11 {
      %c0_10 = arith.constant 0 : index
      %c0_11 = arith.constant 0 : index
      %12 = vector.load %arg8[%c0_10, %c0_11] : memref<8x128xf32, #tpu.memory_space<vmem>>, vector<8x128xf32>
      %cst_12 = arith.constant dense<0.000000e+00> : vector<128xf32>
      %13 = vector.multi_reduction <add>, %12, %cst_12 [0] : vector<8x128xf32> to vector<128xf32>
      %14 = vector.shape_cast %13 : vector<128xf32> to vector<1x128xf32>
      %cst_13 = arith.constant 8.000000e+00 : f32
      %15 = vector.broadcast %cst_13 : f32 to vector<1x128xf32>
      %16 = arith.divf %14, %15 : vector<1x128xf32>
      %17 = vector.broadcast %16 : vector<1x128xf32> to vector<8x128xf32>
      %18 = arith.subf %12, %17 : vector<8x128xf32>
      %19 = arith.mulf %18, %18 : vector<8x128xf32>
      %cst_14 = arith.constant dense<0.000000e+00> : vector<128xf32>
      %20 = vector.multi_reduction <add>, %19, %cst_14 [0] : vector<8x128xf32> to vector<128xf32>
      %21 = vector.shape_cast %20 : vector<128xf32> to vector<1x128xf32>
      %cst_15 = arith.constant 8.000000e+00 : f32
      %22 = vector.broadcast %cst_15 : f32 to vector<1x128xf32>
      %23 = arith.divf %21, %22 : vector<1x128xf32>
      %cst_16 = arith.constant 9.99999974E-6 : f32
      %24 = vector.broadcast %cst_16 : f32 to vector<1x128xf32>
      %25 = arith.addf %23, %24 : vector<1x128xf32>
      %26 = math.rsqrt %25 : vector<1x128xf32>
      %c0_17 = arith.constant 0 : index
      %c0_18 = arith.constant 0 : index
      %27 = vector.load %arg5[%c0_17, %c0_18] : memref<1x128xf32, #tpu.memory_space<vmem>>, vector<1x128xf32>
      %28 = arith.mulf %26, %27 : vector<1x128xf32>
      %29 = vector.broadcast %28 : vector<1x128xf32> to vector<8x128xf32>
      %30 = arith.mulf %18, %29 : vector<8x128xf32>
      %c0_19 = arith.constant 0 : index
      %c0_20 = arith.constant 0 : index
      %31 = vector.load %arg6[%c0_19, %c0_20] : memref<1x128xf32, #tpu.memory_space<vmem>>, vector<1x128xf32>
      %32 = vector.broadcast %31 : vector<1x128xf32> to vector<8x128xf32>
      %33 = arith.addf %30, %32 : vector<8x128xf32>
      %cst_21 = arith.constant 0.000000e+00 : f32
      %34 = vector.broadcast %cst_21 : f32 to vector<8x128xf32>
      %35 = arith.maximumf %33, %34 : vector<8x128xf32>
      %36 = arith.truncf %35 : vector<8x128xf32> to vector<8x128xbf16>
      %c0_22 = arith.constant 0 : index
      %c0_23 = arith.constant 0 : index
      %37 = vector.load %arg7[%c0_22, %c0_23] : memref<8x128xbf16, #tpu.memory_space<vmem>>, vector<8x128xbf16>
      tpu.vector_store %arg7[%c0_22, %c0_23], %36 {strides = array<i32>} : memref<8x128xbf16, #tpu.memory_space<vmem>>, vector<8x128xbf16>,
    } else {
    }
    return
  }
  func.func @transform_0(%arg0: i32, %arg1: i32) -> (i32, i32) {
    %c0_i32 = arith.constant 0 : i32
    %c0_i32_0 = arith.constant 0 : i32
    return %c0_i32, %arg1 : i32, i32
  }
  func.func @transform_1(%arg0: i32, %arg1: i32) -> (i32, i32) {
    %c0_i32 = arith.constant 0 : i32
    return %arg1, %arg0 : i32, i32
  }
  func.func @transform_2(%arg0: i32, %arg1: i32) -> (i32, i32) {
    %c0_i32 = arith.constant 0 : i32
    %c0_i32_0 = arith.constant 0 : i32
    return %c0_i32, %arg0 : i32, i32
  }
  func.func @transform_3(%arg0: i32, %arg1: i32) -> (i32, i32) {
    %c0_i32 = arith.constant 0 : i32
    %c0_i32_0 = arith.constant 0 : i32
    return %c0_i32, %arg0 : i32, i32
  }
  func.func @transform_4(%arg0: i32, %arg1: i32) -> (i32, i32) {
    %c0_i32 = arith.constant 0 : i32
    %c0_i32_0 = arith.constant 0 : i32
    return %c0_i32, %arg0 : i32, i32
  }
  func.func @transform_5(%arg0: i32, %arg1: i32) -> (i32, i32) {
    %c0_i32 = arith.constant 0 : i32
    %c0_i32_0 = arith.constant 0 : i32
    return %c0_i32, %arg0 : i32, i32
  }
}

</mosaic_0001>

<bundles_post_ra>
// kernel: tpu_custom_call.1
= control target key start
LH: loop header
LB: loop body
LE: loop exit
PB: predicated region body
PF: predicated region fallthrough
CT: control target
= control target key end

     0   :  { %10 = vsyncpa [#allocation4], 0  ;;  %s442_s0 = inlined_call_operand.hbm [shape: bf16[8,128], index: 0, kind: input, shape index: {}]   ;;  %s443_s1 = inlined_call_operand.hbm [shape: bf16[128,128], index: 1, kind: input, shape index: {}]   ;;  %s444_s2 = inlined_call_operand.vmem [shape: f32[1,128], index: 2, kind: input, shape index: {}]   ;;  %s445_s3 = inlined_call_operand.vmem [shape: f32[1,128], index: 3, kind: input, shape index: {}]   ;;  %s446_s4 = inlined_call_operand.vmem [shape: f32[1,128], index: 4, kind: input, shape index: {}]   ;;  %s447_s5 = inlined_call_operand.hbm [shape: bf16[8,128], index: 5, kind: output, shape index: {}]  }
   0x1   :  { %11 = vsyncpa [#allocation7], 0 }
   0x2   :  { %12 = vsyncpa [#allocation5], 0  ;;  %s353_s18 = smov [#allocation3]   ;;  %s354_s20 = smov [#allocation6]  }
   0x3   :  { %s19_s19 = sshll.u32 %s353_s18, 4  ;;  %s28_s21 = sshll.u32 %s354_s20, 4  ;;  %s20_s19 = int_to_ptr.vmem [resolvable:$true] %s19_s19  ;;  %s390_s21 = int_to_ptr.vmem [resolvable:$true] %s28_s21 }
   0x4   :  { %s281_s24 = scalar_lea.hbm %s442_s0, 64 }
   0x5   :  { %p282_p0 = scmp.ne.s32.totalorder %s442_s0, %s281_s24  ;;  %p285_p1 = scmp.lt.u32.totalorder %s281_s24, %s442_s0 }
   0x7   :  { %p287_p2 = pnand %p285_p1, %p282_p0 }
   0x9   :  { %290 = shalt.err (!%p287_p2)
}
   0xa   :  { %s291_s29 = scalar_lea.vmem %s20_s19, 64  ;;  %p296_p4 = scmp.lt.s32.totalorder %s20_s19, %s20_s19 }
   0xb   :  { %p292_p3 = scmp.ne.s32.totalorder %s20_s19, %s291_s29  ;;  %p297_p5 = scmp.lt.s32.totalorder %s291_s29, %s291_s29 }
   0xd   :  { %p298_p6 = por %p297_p5, %p296_p4 }
   0xf   :  { %p299_p7 = pnand %p298_p6, %p292_p3 }
  0x11   :  { %302 = shalt.err (!%p299_p7)
}
  0x12   :  { %22 = dma.hbm_to_vmem [thread:$0]  %s442_s0, 64, %s20_s19, [#allocation4]  }
  0x13   :  { %s303_s9 = scalar_lea.hbm %s443_s1, 1024 }
  0x14   :  { %p304_p8 = scmp.ne.s32.totalorder %s443_s1, %s303_s9  ;;  %p307_p9 = scmp.lt.u32.totalorder %s303_s9, %s443_s1 }
  0x16   :  { %p309_p10 = pnand %p307_p9, %p304_p8 }
  0x18   :  { %312 = shalt.err (!%p309_p10)
}
  0x19   :  { %s313_s14 = scalar_lea.vmem %s390_s21, 1024  ;;  %p318_p12 = scmp.lt.s32.totalorder %s390_s21, %s390_s21 }
  0x1a   :  { %p314_p11 = scmp.ne.s32.totalorder %s390_s21, %s313_s14  ;;  %p319_p13 = scmp.lt.s32.totalorder %s313_s14, %s313_s14 }
  0x1c   :  { %p320_p0 = por %p319_p13, %p318_p12 }
  0x1e   :  { %p321_p1 = pnand %p320_p0, %p314_p11 }
  0x20   :  { %324 = shalt.err (!%p321_p1)
}
  0x21   :  { %s355_s0 = smov 64   ;;  %s356_s15 = smov 4  }
  0x22   :  { %34 = dma.hbm_to_vmem [thread:$0]  %s443_s1, 1024, %s390_s21, [#allocation7], %s355_s0, %s355_s0, %s356_s15  }
  0x23   :  { %347 = dma.done.wait [#allocation4], 64  }
  0x24   :  { %348 = vsyncadd [#allocation4], 4294967232 }
  0x25   :  { %349 = dma.done.wait [#allocation7], 1024  }
  0x26   :  { %350 = vsyncadd [#allocation7], 4294966272  ;;  %v357_v0 = vmov 0.0   ;;  %vm358_vm0 = vmmov 0   ;;  %v271_v1 = vld [vmem:[#allocation6] sm:$0xff]   ;;  %v272_v2 = vld [vmem:[#allocation6 + $0x8] sm:$0xff]   ;;  %v193_v33 = vlaneseq }
  0x27   :  { %244 = vmatprep.subr.bf16.mxu0 %v357_v0  ;;  %260 = vmatprep.mubr.msk.bf16.mxu0 %vm358_vm0, %v357_v0  ;;  %v273_v3 = vld [vmem:[#allocation6 + $0x10] sm:$0xff]   ;;  %v274_v4 = vld [vmem:[#allocation6 + $0x18] sm:$0xff]   ;;  %v275_v5 = vld [vmem:[#allocation6 + $0x20] sm:$0xff]   ;;  %s359_s22 = smov [#allocation8]  }
  0x28   :  { %245 = vmatpush3.bf16.msra.mxu0 %v271_v1  ;;  %v276_v6 = vld [vmem:[#allocation6 + $0x28] sm:$0xff]   ;;  %v277_v7 = vld [vmem:[#allocation6 + $0x30] sm:$0xff]   ;;  %v278_v8 = vld [vmem:[#allocation6 + $0x38] sm:$0xff]   ;;  %v194_v34 = vshrl.u32 %v193_v33, 7  ;;  %s215_s23 = sshll.u32 %s359_s22, 4  ;;  %s216_s23 = int_to_ptr.vmem [resolvable:$true] %s215_s23 }
  0x29   :  { %246 = vmatprep.subr.bf16.mxu0 %v357_v0  ;;  %v61_v9 = vld [vmem:[#allocation3] sm:$0xf]  ;;  %s325_s24 = scalar_lea.vmem %s216_s23, 64  ;;  %p330_p3 = scmp.lt.s32.totalorder %s216_s23, %s216_s23 }
  0x2a   :  { %v225_v10 = vld [vmem:[%s444_s2] ss:$0 sm:$0xff]  ;;  %v195_v36 = vsub.s32 0, %v194_v34  ;;  %p326_p2 = scmp.ne.s32.totalorder %s216_s23, %s325_s24  ;;  %p331_p4 = scmp.lt.s32.totalorder %s325_s24, %s325_s24 }
  0x2b   :  { %v191_v35 = vld [vmem:[%s445_s3] sm:$0x1] }
  0x2c   :  { %247 = vmatpush3.bf16.msra.mxu0 %v272_v2  ;;  %v234_v40 = vld [vmem:[%s446_s4] ss:$0 sm:$0xff]  ;;  %p332_p5 = por %p331_p4, %p330_p3 }
  0x2d   :  { %248 = vmatprep.subr.bf16.mxu0 %v357_v0 }
  0x2e   :  { %p333_p6 = pnand %p332_p5, %p326_p2 }
  0x30   :  { %249 = vmatpush3.bf16.msra.mxu0 %v273_v3 }
  0x31   :  { %250 = vmatprep.subr.bf16.mxu0 %v357_v0 }
  0x34   :  { %251 = vmatpush3.bf16.msra.mxu0 %v274_v4 }
  0x35   :  { %252 = vmatprep.subr.bf16.mxu0 %v357_v0 }
  0x38   :  { %253 = vmatpush3.bf16.msra.mxu0 %v275_v5 }
  0x39   :  { %254 = vmatprep.subr.bf16.mxu0 %v357_v0 }
  0x3c   :  { %255 = vmatpush3.bf16.msra.mxu0 %v276_v6 }
  0x3d   :  { %256 = vmatprep.subr.bf16.mxu0 %v357_v0 }
  0x40   :  { %257 = vmatpush3.bf16.msra.mxu0 %v277_v7 }
  0x41   :  { %258 = vmatprep.subr.bf16.mxu0 %v357_v0 }
  0x44   :  { %259 = vmatpush3.bf16.msra.mxu0 %v278_v8 }
  0x47   :  { %261 = vmatmul.mubr.bf16.vlgmr.msra.gmra.mrb[0].mxu0 %v61_v9 }
 0x11a   :  { %v160_v11 = vpop.f32.mrb[0].mxu0 }
 0x11b   :  { %v166_v12 = vadd.f32 %v225_v10, %v160_v11  ;;  %v262_v13 = vpop.f32.mrb[1].mxu0 }
 0x11c   :  { %v163_v14 = vpop.f32.mrb[2].mxu0 }
 0x11d   :  { %v172_v15 = vrot.slane %v166_v12, 4  ;;  %v263_v16 = vpop.f32.mrb[3].mxu0 }
 0x11f   :  { %v173_v17 = vadd.f32 %v172_v15, %v166_v12 }
 0x121   :  { %v174_v18 = vrot.slane %v173_v17, 2 }
 0x123   :  { %v175_v19 = vadd.f32 %v174_v18, %v173_v17 }
 0x125   :  { %v176_v20 = vrot.slane %v175_v19, 1 }
 0x127   :  { %v177_v21 = vadd.f32 %v176_v20, %v175_v19 }
 0x129   :  { %v179_v22 = vmul.f32 0.125, %v177_v21 }
 0x12b   :  { %v180_v23 = vsub.f32 %v166_v12, %v179_v22 }
 0x12d   :  { %v181_v24 = vmul.f32 %v180_v23, %v180_v23 }
 0x12f   :  { %v182_v25 = vrot.slane %v181_v24, 4 }
 0x131   :  { %v183_v26 = vadd.f32 %v182_v25, %v181_v24 }
 0x133   :  { %v184_v27 = vrot.slane %v183_v26, 2 }
 0x135   :  { %v185_v28 = vadd.f32 %v184_v27, %v183_v26 }
 0x137   :  { %v186_v29 = vrot.slane %v185_v28, 1 }
 0x139   :  { %v187_v30 = vadd.f32 %v186_v29, %v185_v28 }
 0x13b   :  { %v188_v31 = vmul.f32 0.125, %v187_v30 }
 0x13d   :  { %v189_v32 = vadd.f32 1e-05, %v188_v31 }
 0x13f   :  { %279 = vrsqrt.f32 %v189_v32 }
 0x149   :  { %v280_v37 = vpop.eup %279 }
 0x14a   :  { %v192_v38 = vmul.f32 %v280_v37, %v191_v35 }
 0x14c   :  { %v196_v39 = vrot.slane %v192_v38, %v195_v36 }
 0x14e   :  { %v197_v41 = vmul.f32 %v196_v39, %v180_v23 }
 0x150   :  { %v205_v42 = vadd.f32 %v234_v40, %v197_v41 }
 0x152   :  { %v206_v43 = vmax.f32 %v205_v42, 0.0 }
 0x154   :  { %v207_v44 = vpack.c.bf16 %v206_v43, %v206_v43 }
 0x156   :  { %208 = vst [vmem:[#allocation8] sm:$0xf] %v207_v44 }
 0x157   :  { %336 = shalt.err (!%p333_p6)
}
 0x158   :  { %s337_s26 = scalar_lea.hbm %s447_s5, 64 }
 0x159   :  { %p338_p7 = scmp.ne.s32.totalorder %s447_s5, %s337_s26  ;;  %p341_p8 = scmp.lt.u32.totalorder %s337_s26, %s447_s5 }
 0x15b   :  { %p343_p9 = pnand %p341_p8, %p338_p7 }
 0x15d   :  { %346 = shalt.err (!%p343_p9)
}
 0x15e   :  { %218 = dma.vmem_to_hbm [thread:$0]  %s216_s23, 64, %s447_s5, [#allocation5]  }
 0x15f   :  { %351 = dma.done.wait [#allocation5], 64  }
 0x160   :  { %352 = vsyncadd [#allocation5], 4294967232 }
 0x161   :  { %222 = vsyncpa [#allocation4], 1 }
 0x162   :  { %223 = vsyncpa [#allocation7], 1 }
 0x163   :  { %224 = vsyncpa [#allocation5], 1 }

</bundles_post_ra>
